<compile_context>
chip_gen: v7x
topology: tpu7x:2x2x1
jax: 0.10.0
libtpu: 0.0.40
codegen_flags: <defaults>
</compile_context>

<pallas_src>
import functools

import jax
import jax.numpy as jnp
from jax.experimental import pallas as pl
from jax.experimental.pallas import tpu as pltpu


def _round_up(v, m):
    return ((v + m - 1) // m) * m


def _rope_kernel(x_ref, pos_ref, rot_ref, o_ref, shifted_ref):
    # x_ref:       (TM, Dp)   flattened (batch*seq) rows of the input
    # pos_ref:     (TM, Dp)   matching positional-embedding rows
    # rot_ref:     (Dp, TN)   column tile of the rotation matrix
    # o_ref:       (TM, TN)   output tile
    # shifted_ref: (TM, Dp)   VMEM scratch holding (x + pos) in MXU operand dtype

    # Hoist the VPU add (and optional bf16 cast) out of the column loop: it is
    # computed once per M tile, at the first column step only.
    @pl.when(pl.program_id(1) == 0)
    def _():
        shifted = x_ref[...].astype(jnp.float32) + pos_ref[...]
        shifted_ref[...] = shifted.astype(shifted_ref.dtype)

    o_ref[...] = jnp.dot(
        shifted_ref[...], rot_ref[...],
        preferred_element_type=jnp.float32).astype(o_ref.dtype)


def rotary_positional_embedding(x, rotation_matrix, positional_embedding,
                                *, use_bf16_matmul=False):
    """Computes (x + positional_embedding[:S]) @ rotation_matrix.

    x: (B, S, D); rotation_matrix: (D, D); positional_embedding: (max_seq, D).
    """
    B, S, D = x.shape
    assert positional_embedding.shape[0] >= S, (
        "positional_embedding has fewer rows than seq_len")
    assert rotation_matrix.shape == (D, D), "rotation_matrix must be (D, D)"

    out_dtype = x.dtype
    x_itemsize = jnp.dtype(x.dtype).itemsize
    rot_dtype = jnp.bfloat16 if use_bf16_matmul else jnp.float32
    rot_itemsize = jnp.dtype(rot_dtype).itemsize
    shift_itemsize = rot_itemsize  # scratch matches MXU operand dtype

    # ---- layout: pad D to a lane-dense multiple of 128 ----
    Dp = max(_round_up(D, 128), 128)

    # ---- rotation-matrix residency / column tiling ----
    # Keep rot fully VMEM-resident when its (double-buffered) footprint is
    # modest; it is then DMA'd from HBM exactly once (constant block index).
    if 2 * Dp * Dp * rot_itemsize <= (24 << 20):
        TN = Dp
    else:
        TN = 256 if Dp % 256 == 0 else 128

    budget = 48 << 20  # leave headroom under v7x's 64 MiB VMEM per TensorCore

    def _vmem_bytes(tm):
        return (2 * tm * Dp * x_itemsize       # x blocks (double-buffered)
                + 2 * tm * Dp * 4              # pos blocks (f32)
                + 2 * Dp * TN * rot_itemsize   # rot blocks
                + 2 * tm * TN * x_itemsize     # out blocks
                + tm * Dp * shift_itemsize)    # shifted scratch

    # ---- M (flattened batch*seq) tile: prefer large MXU-friendly tiles,
    # pad S up rather than falling back to sub-128 tiles when S is big. ----
    if S < 128:
        TM = _round_up(S, 8)
    else:
        TM = 256
        if _round_up(S, 256) - S > S // 2:   # avoid >50% padded (wasted) rows
            TM = 128
    while TM > 8 and _vmem_bytes(TM) > budget:
        TM //= 2

    Sp = _round_up(S, TM)
    seq_blocks = Sp // TM
    M = B * Sp

    # ---- wrapper-side padding / flattening (cheap XLA ops) ----
    pos = positional_embedding[:S].astype(jnp.float32)
    rot = rotation_matrix.astype(rot_dtype)
    if Sp != S or Dp != D:
        x = jnp.pad(x, ((0, 0), (0, Sp - S), (0, Dp - D)))
        pos = jnp.pad(pos, ((0, Sp - S), (0, Dp - D)))
        rot = jnp.pad(rot, ((0, Dp - D), (0, Dp - D)))
    x_flat = x.reshape(M, Dp)

    grid = (M // TM, Dp // TN)   # M tiles outermost (parallel), columns inner

    vmem_limit = int(min(max(_vmem_bytes(TM) + (8 << 20), 32 << 20), 56 << 20))

    cost = pl.CostEstimate(
        flops=int(2 * M * Dp * Dp),
        transcendentals=0,
        bytes_accessed=int(M * Dp * x_itemsize        # x in
                           + Sp * Dp * 4              # pos in
                           + Dp * Dp * rot_itemsize   # rot in (resident: once)
                           + M * Dp * x_itemsize))    # out

    out_flat = pl.pallas_call(
        _rope_kernel,
        out_shape=jax.ShapeDtypeStruct((M, Dp), out_dtype),
        grid=grid,
        in_specs=[
            pl.BlockSpec((TM, Dp), lambda i, n: (i, 0)),               # x rows
            pl.BlockSpec((TM, Dp), lambda i, n: (i % seq_blocks, 0)),  # pos rows
            pl.BlockSpec((Dp, TN), lambda i, n: (0, n)),               # rot cols
        ],
        out_specs=pl.BlockSpec((TM, TN), lambda i, n: (i, n)),
        scratch_shapes=[pltpu.VMEM((TM, Dp), rot_dtype)],
        compiler_params=pltpu.CompilerParams(
            dimension_semantics=("parallel", "arbitrary"),
            vmem_limit_bytes=vmem_limit,
        ),
        cost_estimate=cost,
    )(x_flat, pos, rot)

    out = out_flat.reshape(B, Sp, Dp)
    if Sp != S or Dp != D:
        out = out[:, :S, :D]
    return out


def make_params(d_model, max_seq_len=5000, dtype=jnp.float32):
    """Deterministic parameter construction, mirroring the PyTorch __init__."""
    i = jnp.arange(d_model, dtype=dtype)[:, None]
    j = jnp.arange(d_model, dtype=dtype)[None, :]
    rotation_matrix = jnp.cos(i * j * 0.01)                       # (D, D)

    position = jnp.arange(max_seq_len, dtype=dtype)[:, None]
    div_term = jnp.arange(d_model, dtype=dtype)
    positional_embedding = jnp.cos(position * div_term * 0.01)    # (max_seq, D)
    return rotation_matrix, positional_embedding


if __name__ == "__main__":
    key = jax.random.PRNGKey(0)

    # ---- Small demo shape (module layout: (batch, seq_len, d_model)) ----
    B, S, D = 2, 8, 32
    rot, pos = make_params(D, max_seq_len=64)
    x = jax.random.normal(key, (B, S, D), dtype=jnp.float32)

    out = jax.block_until_ready(rotary_positional_embedding(x, rot, pos))
    ref = jnp.matmul(x + pos[:S], rot, precision=jax.lax.Precision.HIGHEST)
    assert out.shape == (B, S, D)
    assert jnp.allclose(out, ref, atol=1e-3, rtol=1e-3), "small-shape mismatch"

    # ---- Larger shape exercising flattened-M tiling + resident rot matrix ----
    B2, S2, D2 = 2, 512, 384          # TM=256, TN=384 -> grid (4, 1)
    rot2, pos2 = make_params(D2, max_seq_len=600)
    x2 = jax.random.normal(jax.random.PRNGKey(1), (B2, S2, D2), dtype=jnp.float32)

    out2 = jax.block_until_ready(rotary_positional_embedding(x2, rot2, pos2))
    ref2 = jnp.matmul(x2 + pos2[:S2], rot2, precision=jax.lax.Precision.HIGHEST)
    assert out2.shape == (B2, S2, D2)
    assert jnp.allclose(out2, ref2, atol=2e-3, rtol=2e-3), "large-shape mismatch"

    # ---- bf16-MXU-operand path (v5e/v6e/v7x throughput option), loose tol ----
    out_bf16 = jax.block_until_ready(
        rotary_positional_embedding(x, rot, pos, use_bf16_matmul=True))
    max_err = jnp.max(jnp.abs(out_bf16 - ref))
    assert max_err < 5e-2 * (jnp.max(jnp.abs(ref)) + 1.0), "bf16 path mismatch"

    print("KERNEL_OK")
</pallas_src>

<mosaic_0001>
module attributes {stable_mosaic.version = 11 : i64} {
  func.func @_rope_kernel(%arg0: i32, %arg1: i32, %arg2: memref<8x128xf32, #tpu.memory_space<vmem>>, %arg3: memref<8x128xf32, #tpu.memory_space<vmem>>, %arg4: memref<128x128xf32, #tpu.memory_space<vmem>>, %arg5: memref<8x128xf32, #tpu.memory_space<vmem>>, %arg6: memref<8x128xf32, #tpu.memory_space<vmem>>) attributes {dimension_semantics = [#tpu.dimension_semantics<parallel>, #tpu.dimension_semantics<arbitrary>], iteration_bounds = array<i64: 2, 1>, scalar_prefetch = 0 : i64, scratch_operands = 1 : i64, tpu.core_type = #tpu.core_type<tc>, window_params = [{transform_indices = @transform_0, window_bounds = array<i64: 8, 128>}, {transform_indices = @transform_1, window_bounds = array<i64: 8, 128>}, {transform_indices = @transform_2, window_bounds = array<i64: 128, 128>}, {transform_indices = @transform_3, window_bounds = array<i64: 8, 128>}]} {
    %c0_i32 = arith.constant 0 : i32
    %0 = arith.cmpi eq, %arg1, %c0_i32 : i32
    %1 = arith.extui %0 : i1 to i32
    %c0_i32_0 = arith.constant 0 : i32
    %2 = arith.cmpi ne, %1, %c0_i32_0 : i32
    scf.if %2 {
      %c0_6 = arith.constant 0 : index
      %c0_7 = arith.constant 0 : index
      %7 = vector.load %arg2[%c0_6, %c0_7] : memref<8x128xf32, #tpu.memory_space<vmem>>, vector<8x128xf32>
      %c0_8 = arith.constant 0 : index
      %c0_9 = arith.constant 0 : index
      %8 = vector.load %arg3[%c0_8, %c0_9] : memref<8x128xf32, #tpu.memory_space<vmem>>, vector<8x128xf32>
      %9 = arith.addf %7, %8 : vector<8x128xf32>
      %c0_10 = arith.constant 0 : index
      %c0_11 = arith.constant 0 : index
      %10 = vector.load %arg6[%c0_10, %c0_11] : memref<8x128xf32, #tpu.memory_space<vmem>>, vector<8x128xf32>
      tpu.vector_store %arg6[%c0_10, %c0_11], %9 {strides = array<i32>} : memref<8x128xf32, #tpu.memory_space<vmem>>, vector<8x128xf32>,
    } else {
    }
    %c0 = arith.constant 0 : index
    %c0_1 = arith.constant 0 : index
    %3 = vector.load %arg6[%c0, %c0_1] : memref<8x128xf32, #tpu.memory_space<vmem>>, vector<8x128xf32>
    %c0_2 = arith.constant 0 : index
    %c0_3 = arith.constant 0 : index
    %4 = vector.load %arg4[%c0_2, %c0_3] : memref<128x128xf32, #tpu.memory_space<vmem>>, vector<128x128xf32>
    %cst = arith.constant dense<0.000000e+00> : vector<8x128xf32>
    %5 = tpu.matmul %3, %4, %cst {dimension_numbers = #tpu.dot_dimension_numbers<[1], [0], [0], [1], [0, 0, 1, 1], [], []>} : vector<8x128xf32>, vector<128x128xf32>, vector<8x128xf32> -> vector<8x128xf32>
    %c0_4 = arith.constant 0 : index
    %c0_5 = arith.constant 0 : index
    %6 = vector.load %arg5[%c0_4, %c0_5] : memref<8x128xf32, #tpu.memory_space<vmem>>, vector<8x128xf32>
    tpu.vector_store %arg5[%c0_4, %c0_5], %5 {strides = array<i32>} : memref<8x128xf32, #tpu.memory_space<vmem>>, vector<8x128xf32>,
    return
  }
  func.func @transform_0(%arg0: i32, %arg1: i32) -> (i32, i32) {
    %c0_i32 = arith.constant 0 : i32
    %c0_i32_0 = arith.constant 0 : i32
    return %arg0, %c0_i32 : i32, i32
  }
  func.func @transform_1(%arg0: i32, %arg1: i32) -> (i32, i32) {
    %c1_i32 = arith.constant 1 : i32
    %c0_i32 = arith.constant 0 : i32
    %0 = arith.cmpi eq, %c1_i32, %c0_i32 : i32
    %c1_i32_0 = arith.constant 1 : i32
    %1 = arith.select %0, %c1_i32_0, %c1_i32 : i32
    %2 = arith.remsi %arg0, %1 : i32
    %c0_i32_1 = arith.constant 0 : i32
    %3 = arith.cmpi ne, %2, %c0_i32_1 : i32
    %c0_i32_2 = arith.constant 0 : i32
    %4 = arith.cmpi slt, %2, %c0_i32_2 : i32
    %c0_i32_3 = arith.constant 0 : i32
    %5 = arith.cmpi slt, %1, %c0_i32_3 : i32
    %6 = arith.xori %4, %5 : i1
    %7 = arith.andi %6, %3 : i1
    %8 = arith.addi %2, %1 : i32
    %9 = arith.select %7, %8, %2 : i32
    %c0_i32_4 = arith.constant 0 : i32
    %c0_i32_5 = arith.constant 0 : i32
    return %9, %c0_i32_4 : i32, i32
  }
  func.func @transform_2(%arg0: i32, %arg1: i32) -> (i32, i32) {
    %c0_i32 = arith.constant 0 : i32
    %c0_i32_0 = arith.constant 0 : i32
    return %c0_i32, %arg1 : i32, i32
  }
  func.func @transform_3(%arg0: i32, %arg1: i32) -> (i32, i32) {
    %c0_i32 = arith.constant 0 : i32
    return %arg0, %arg1 : i32, i32
  }
}

</mosaic_0001>

<bundles_post_ra>
// kernel: tpu_custom_call.1
= control target key start
LH: loop header
LB: loop body
LE: loop exit
PB: predicated region body
PF: predicated region fallthrough
CT: control target
= control target key end

     0   :  { %8 = vsyncpa [#allocation4], 0  ;;  %s1079_s0 = inlined_call_operand.hbm [shape: f32[16,128], index: 0, kind: input, shape index: {}]   ;;  %s1080_s1 = inlined_call_operand.hbm [shape: f32[8,128], index: 1, kind: input, shape index: {}]   ;;  %s1081_s2 = inlined_call_operand.hbm [shape: f32[128,128], index: 2, kind: input, shape index: {}]   ;;  %s1082_s3 = inlined_call_operand.hbm [shape: f32[16,128], index: 3, kind: output, shape index: {}]  }
   0x1   :  { %10 = vsyncpa [#allocation4 + $0x1], 0 }
   0x2   :  { %11 = vsyncpa [#allocation7], 0 }
   0x3   :  { %12 = vsyncpa [#allocation5], 0 }
   0x4   :  { %14 = vsyncpa [#allocation5 + $0x1], 0  ;;  %s829_s12 = smov 0   ;;  %s831_s13 = smov 0  }
   0x5   :  { %s833_s14 = smov 0   ;;  %s835_s15 = smov 0  }
   0x6   :  { %s837_s16 = smov 0   ;;  %s839_s17 = smov 0  }
   0x7 LB: > { %s445_s18 = sadd.s32 4294967295, %s798_s17   ;;  %s446_s19 = sadd.s32 4294967294, %s798_s17   ;;  %s798_s17 = sphi %s839_s17, %s20_s17   ;;  %s794_s16 = sphi %s837_s16, %s1105_s16   ;;  %s790_s15 = sphi %s835_s15, %s1104_s15   ;;  %s786_s14 = sphi %s833_s14, %s1103_s14   ;;  %s782_s13 = sphi %s831_s13, %s1102_s13   ;;  %s778_s12 = sphi %s829_s12, %s1101_s12  }
   0x8   : > { %p52_p0 = scmp.ne.s32.totalorder %s782_s13, %s778_s12  ;;  %p863_p1 = scmp.eq.s32.totalorder %s445_s18, 0 }
   0x9   : > { %p867_p2 = scmp.eq.s32.totalorder %s445_s18, 1  ;;  %p131_p3 = scmp.eq.s32.totalorder %s446_s19, 1 }
   0xa   : > { %s1087_s20 = scalar_select %p863_p1, 1, 0 }
   0xb   : > { %s1088_s21 = scalar_select %p867_p2, 1, 0 }
   0xc   : > { %p873_p4 = por %p863_p1, %p52_p0  ;;  %p447_p5 = scmp.ge.s32.totalorder %s798_s17, 1 }
   0xd   : > { %p878_p6 = por %p131_p3, %p52_p0  ;;  %p138_p7 = scmp.lt.s32.totalorder %s798_s17, 3 }
   0xe   : > { %s1089_s22 = scalar_select %p873_p4, 1, 0 }
   0xf   : > { %s1090_s23 = scalar_select %p878_p6, 1, 0 }
  0x10   : > { %p883_p8 = pnand %p447_p5, %p138_p7  ;;  %s800_s25 = smov [#allocation6]  }
  0x11   : > { %s151_s26 = sshll.u32 %s800_s25, 4  ;;  %s801_s27 = smov [#allocation8]   ;;  %s152_s26 = int_to_ptr.vmem [resolvable:$true] %s151_s26 }
  0x12   : > { %s1091_s24 = scalar_select %p883_p8, 1, 0 }
  0x13   : > { %p550_p10 = pneg %p883_p8  ;;  %s163_s28 = sshll.u32 %s801_s27, 4  ;;  %s896_s28 = int_to_ptr.vmem [resolvable:$true] %s163_s28 }
  0x14   : > { %s626_s5 = scalar_lea.hbm %s1080_s1, 128 }
  0x15   : > { %p892_p11 = pnand %p550_p10, %p863_p1  ;;  %p627_p12 = scmp.ne.s32.totalorder %s1080_s1, %s626_s5 }
  0x16   : > { %p633_p5 = scmp.lt.u32.totalorder %s626_s5, %s1080_s1 }
  0x17   : > { %p628_p13 = pneg %p892_p11 }
  0x19   : > { %p629_p0 = pnand %p628_p13, %p627_p12 }
  0x1b   : > { %p630_p3 = pneg %p629_p0 }
  0x1d   : > { %p635_p7 = pnand %p633_p5, %p630_p3 }
  0x1f   : > { %638 = shalt.err (!%p635_p7)
}
  0x20   : > { %s639_s10 = scalar_lea.vmem %s152_s26, 128  ;;  %p647_p1 = scmp.lt.s32.totalorder %s152_s26, %s152_s26 }
  0x21   : > { %p640_p10 = scmp.ne.s32.totalorder %s152_s26, %s639_s10  ;;  %p648_p4 = scmp.lt.s32.totalorder %s639_s10, %s639_s10 }
  0x23   : > { %p642_p9 = pnand %p640_p10, %p628_p13  ;;  %p649_p8 = por %p648_p4, %p647_p1 }
  0x25   : > { %p643_p6 = pneg %p642_p9 }
  0x27   : > { %p650_p2 = pnand %p649_p8, %p643_p6 }
  0x29   : > { %653 = shalt.err (!%p650_p2)
}
  0x2a   : > { %553 = dma.hbm_to_vmem [thread:$0]  (!%p892_p11), %s1080_s1, 128, %s152_s26, [#allocation7]  }
  0x2b   : > { %s654_s27 = scalar_lea.hbm %s1081_s2, 2048 }
  0x2c   : > { %p655_p9 = scmp.ne.s32.totalorder %s1081_s2, %s654_s27  ;;  %p661_p2 = scmp.lt.u32.totalorder %s654_s27, %s1081_s2 }
  0x2e   : > { %p657_p1 = pnand %p655_p9, %p628_p13 }
  0x30   : > { %p658_p4 = pneg %p657_p1 }
  0x32   : > { %p663_p6 = pnand %p661_p2, %p658_p4 }
  0x34   : > { %666 = shalt.err (!%p663_p6)
}
  0x35   : > { %s667_s26 = scalar_lea.vmem %s896_s28, 2048  ;;  %p675_p3 = scmp.lt.s32.totalorder %s896_s28, %s896_s28 }
  0x36   : > { %p668_p8 = scmp.ne.s32.totalorder %s896_s28, %s667_s26  ;;  %p676_p5 = scmp.lt.s32.totalorder %s667_s26, %s667_s26 }
  0x38   : > { %p670_p12 = pnand %p668_p8, %p628_p13  ;;  %p677_p7 = por %p676_p5, %p675_p3 }
  0x3a   : > { %p671_p0 = pneg %p670_p12 }
  0x3c   : > { %p678_p10 = pnand %p677_p7, %p671_p0 }
  0x3e   : > { %681 = shalt.err (!%p678_p10)
}
  0x3f   : > { %s802_s7 = smov 128   ;;  %s803_s8 = smov 8  }
  0x40   : > { %556 = dma.hbm_to_vmem [thread:$0]  (!%p892_p11), %s1081_s2, 2048, %s896_s28, [#allocation7], %s802_s7, %s802_s7, %s803_s8  }
  0x41   : > { %s32_s11 = sadd.s32 1, %s794_s16  ;;  %s39_s18 = sadd.s32 1, %s786_s14 }
  0x42   : > { %p34_p13 = scmp.ge.s32.totalorder %s32_s11, 2  ;;  %p46_p9 = scmp.ne.s32.totalorder %s786_s14, %s782_s13 }
  0x43   : > { %p47_p1 = scmp.eq.s32.totalorder %s798_s17, 0  ;;  %p567_p4 = scmp.lt.s32.totalorder %s798_s17, 2 }
  0x44   : > { %s1107_s11 = smov (%p34_p13, %s32_s11), 0  ;;  %p1093_p6 = scmp.ne.s32.totalorder %s1088_s21, 0 }
  0x45   : > { %p48_p2 = por %p47_p1, %p46_p9  ;;  %s36_s29 = ssub.s32 %s794_s16, %s1107_s11 }
  0x46   : > { %p955_p8 = por %p1093_p6, %p46_p9  ;;  %s177_s25 = sand.u32 1, %s786_s14  }
  0x47   : > { %p37_p12 = scmp.eq.s32.totalorder %s36_s29, 0  ;;  %s451_s28 = sshll.u32 %s177_s25, 3 }
  0x48   : > { %s452_s27 = sshll.u32 %s794_s16, 7  ;;  %s181_s21 = scalar_lea.vmem [#allocation3], %s451_s28 }
  0x49   : > { %s964_s30 = scalar_select %p37_p12, %s786_s14, %s39_s18  }
  0x4a   : > { %s969_s6 = scalar_lea.hbm %s1079_s0, %s452_s27  ;;  %s188_s26 = sshll.u32 %s181_s21, 4  ;;  %s977_s26 = int_to_ptr.vmem [resolvable:$true] %s188_s26 }
  0x4b   : > { %p973_p11 = pnand %p567_p4, %p48_p2  ;;  %s178_s8 = scalar_lea.sflag [#allocation4], %s177_s25 }
  0x4c   : > { %s682_s9 = scalar_lea.hbm %s969_s6, 128  ;;  %s687_s29 = scalar_lea.hbm %s1079_s0, 256 }
  0x4d   : > { %p683_p0 = scmp.ne.s32.totalorder %s969_s6, %s682_s9  ;;  %p684_p3 = pneg %p973_p11 }
  0x4e   : > { %p688_p10 = scmp.lt.u32.totalorder %s969_s6, %s1079_s0  ;;  %p689_p13 = scmp.lt.u32.totalorder %s687_s29, %s682_s9 }
  0x4f   : > { %p685_p5 = pnand %p684_p3, %p683_p0  ;;  %p691_p1 = scmp.lt.u32.totalorder %s682_s9, %s969_s6 }
  0x50   : > { %p690_p9 = por %p689_p13, %p688_p10 }
  0x51   : > { %p686_p7 = pneg %p685_p5 }
  0x52   : > { %p692_p4 = por %p691_p1, %p690_p9 }
  0x54   : > { %p693_p2 = pnand %p692_p4, %p686_p7 }
  0x56   : > { %696 = shalt.err (!%p693_p2)
}
  0x57   : > { %s697_s25 = scalar_lea.vmem %s977_s26, 128  ;;  %s804_s4 = smov [#allocation3]  }
  0x58   : > { %p698_p6 = scmp.ne.s32.totalorder %s977_s26, %s697_s25  ;;  %s702_s5 = sshll.u32 %s804_s4, 4  ;;  %s703_s5 = int_to_ptr.vmem [resolvable:$false] %s702_s5 }
  0x59   : > { %s704_s21 = scalar_lea.vmem %s703_s5, 256  ;;  %p705_p5 = scmp.lt.s32.totalorder %s977_s26, %s703_s5 }
  0x5a   : > { %p700_p12 = pnand %p698_p6, %p684_p3  ;;  %p706_p10 = scmp.lt.s32.totalorder %s704_s21, %s697_s25 }
  0x5c   : > { %p701_p0 = pneg %p700_p12  ;;  %p707_p13 = por %p706_p10, %p705_p5 }
  0x5e   : > { %p708_p9 = pnand %p707_p13, %p701_p0 }
  0x60   : > { %711 = shalt.err (!%p708_p9)
}
  0x61   : > { %560 = dma.hbm_to_vmem [thread:$0]  (!%p973_p11), %s969_s6, 128, %s977_s26, %s178_s8  }
  0x62   : > { %p1096_p7 = scmp.ne.s32.totalorder %s1091_s24, 0 }
  0x63   : > { %s1007_s9 = sand.u32 (!%p1096_p7), 1, %s782_s13   ;;  %p1097_p3 = scmp.ne.s32.totalorder (!%p1096_p7), %s1089_s22, 0 }
  0x64   : > { %197 = sbr.rel (%p1096_p7) target bundleno = 372 (0x174), region = 32  ;;  %s454_s10 = sshll.u32 (!%p1096_p7), %s1007_s9, 3 }
  0x65   : > { %s200_s18 = scalar_lea.sflag (!%p1096_p7), [#allocation4], %s1007_s9  ;;  %s1013_s29 = scalar_lea.vmem (!%p1096_p7), [#allocation3], %s454_s10 }
  0x6b   : > { %765 = dma.done.wait (%p1097_p3), %s200_s18, 128  }
  0x6c   : > { %767 = vsyncadd (%p1097_p3), %s200_s18, 4294967168  ;;  %p1098_p11 = scmp.ne.s32.totalorder %s1087_s20, 0 }
  0x6e   : > { %769 = dma.done.wait (%p1098_p11), [#allocation7], 2176  }
  0x6f   : > { %771 = vsyncadd (%p1098_p11), [#allocation7], 4294965120  ;;  %v805_v0 = vmov 0.0|0.0   ;;  %vm806_vm0 = vmmov 0   ;;  %v807_v1 = vmov 0.0   ;;  %v243_v2 = vld [vmem:[#allocation8] sm:$0xff] }
  0x70   : > { %514 = vmatprep.subr.bf16.mxu0 %v805_v0  ;;  %511 = vmatprep.mubr.msk.f32.mxu0 %vm806_vm0, %v807_v1  ;;  %v244_v3 = vld [vmem:[#allocation8 + $0x8] sm:$0xff]  ;;  %v245_v4 = vld [vmem:[#allocation8 + $0x10] sm:$0xff]  ;;  %v246_v6 = vld [vmem:[#allocation8 + $0x18] sm:$0xff]  ;;  %s233_s20 = scalar_lea.vmem [#allocation9], %s454_s10  ;;  %s459_s24 = sshll.u32 %s790_s15, 7 }
  0x71   : > { %v515_v5 = vpack.c.bf16 %v244_v3, %v243_v2  ;;  %v518_v7 = vpack.c.bf16 %v246_v6, %v245_v4  ;;  %v247_v8 = vld [vmem:[#allocation8 + $0x20] sm:$0xff]  ;;  %v248_v9 = vld [vmem:[#allocation8 + $0x28] sm:$0xff]  ;;  %v249_v11 = vld [vmem:[#allocation8 + $0x30] sm:$0xff]  ;;  %s345_s22 = sshll.u32 %s233_s20, 4  ;;  %s1032_s7 = scalar_lea.hbm %s1082_s3, %s459_s24  ;;  %s1027_s22 = int_to_ptr.vmem [resolvable:$true] %s345_s22 }
  0x72   : > { %v521_v10 = vpack.c.bf16 %v248_v9, %v247_v8  ;;  %v250_v12 = vld [vmem:[#allocation8 + $0x38] sm:$0xff]  ;;  %v251_v14 = vld [vmem:[#allocation8 + $0x40] sm:$0xff]  ;;  %v252_v15 = vld [vmem:[#allocation8 + $0x48] sm:$0xff]  ;;  %s331_s8 = scalar_lea.sflag [#allocation5], %s1007_s9  ;;  %s712_s28 = scalar_lea.vmem %s1027_s22, 128 }
  0x73   : > { %516 = vmatpush3.bf16.msra.mxu0 %v515_v5  ;;  %v524_v13 = vpack.c.bf16 %v250_v12, %v249_v11  ;;  %v527_v16 = vpack.c.bf16 %v252_v15, %v251_v14  ;;  %v253_v17 = vld [vmem:[#allocation8 + $0x50] sm:$0xff]  ;;  %v254_v18 = vld [vmem:[#allocation8 + $0x58] sm:$0xff]  ;;  %v255_v20 = vld [vmem:[#allocation8 + $0x60] sm:$0xff]  ;;  %p713_p1 = scmp.ne.s32.totalorder %s1027_s22, %s712_s28  ;;  %s808_s15 = smov [#allocation9]  }
  0x74   : > { %517 = vmatprep.subr.bf16.mxu0 %v805_v0  ;;  %v530_v19 = vpack.c.bf16 %v254_v18, %v253_v17  ;;  %v256_v21 = vld [vmem:[#allocation8 + $0x68] sm:$0xff]  ;;  %v257_v23 = vld [vmem:[#allocation8 + $0x70] sm:$0xff]  ;;  %v258_v24 = vld [vmem:[#allocation8 + $0x78] sm:$0xff]  ;;  %s716_s27 = sshll.u32 %s808_s15, 4  ;;  %s717_s27 = int_to_ptr.vmem [resolvable:$false] %s716_s27 }
  0x75   : > { %v533_v22 = vpack.c.bf16 %v256_v21, %v255_v20  ;;  %v536_v25 = vpack.c.bf16 %v258_v24, %v257_v23  ;;  %v238_v26 = vld [vmem:[%s1013_s29] sm:$0xff]  ;;  %v239_v27 = vld [vmem:[#allocation6] sm:$0xff]  ;;  %p714_p4 = pnand %p713_p1, %p955_p8  ;;  %s718_s25 = scalar_lea.vmem %s717_s27, 256 }
  0x76   : > { %v240_v28 = vadd.f32 %v239_v27, %v238_v26  ;;  %p719_p6 = scmp.lt.s32.totalorder %s1027_s22, %s717_s27  ;;  %p720_p12 = scmp.lt.s32.totalorder %s718_s25, %s712_s28 }
  0x77   : > { %519 = vmatpush3.bf16.msra.mxu0 %v518_v7  ;;  %p715_p2 = pneg %p714_p4 }
  0x78   : > { %520 = vmatprep.subr.bf16.mxu0 %v805_v0  ;;  %p721_p0 = por %p720_p12, %p719_p6 }
  0x7a   : > { %p722_p5 = pnand %p721_p0, %p715_p2 }
  0x7b   : > { %522 = vmatpush3.bf16.msra.mxu0 %v521_v10 }
  0x7c   : > { %523 = vmatprep.subr.bf16.mxu0 %v805_v0 }
  0x7f   : > { %525 = vmatpush3.bf16.msra.mxu0 %v524_v13 }
  0x80   : > { %526 = vmatprep.subr.bf16.mxu0 %v805_v0 }
  0x83   : > { %528 = vmatpush3.bf16.msra.mxu0 %v527_v16 }
  0x84   : > { %529 = vmatprep.subr.bf16.mxu0 %v805_v0 }
  0x87   : > { %531 = vmatpush3.bf16.msra.mxu0 %v530_v19 }
  0x88   : > { %532 = vmatprep.subr.bf16.mxu0 %v805_v0 }
  0x8b   : > { %534 = vmatpush3.bf16.msra.mxu0 %v533_v22 }
  0x8c   : > { %535 = vmatprep.subr.bf16.mxu0 %v805_v0 }
  0x8f   : > { %537 = vmatpush3.bf16.msra.mxu0 %v536_v25 }
  0x92   : > { %512 = vmatmul.mubr.f32.vlgmr.msra.gmra.mrb[0].mxu0 %v240_v28 }
 0x165   : > { %v325_v29 = vpop.f32.mrb[0].mxu0 }
 0x166   : > { %329 = vst [vmem:[%s233_s20] sm:$0xff] %v325_v29  ;;  %v513_v30 = vpop.f32.mrb[1].mxu0 }
 0x167   : > { %725 = shalt.err (!%p722_p5)
}
 0x168   : > { %s726_s4 = scalar_lea.hbm %s1032_s7, 128  ;;  %s730_s9 = scalar_lea.hbm %s1082_s3, 256 }
 0x169   : > { %p727_p10 = scmp.ne.s32.totalorder %s1032_s7, %s726_s4  ;;  %p731_p7 = scmp.lt.u32.totalorder %s1032_s7, %s1082_s3 }
 0x16a   : > { %p732_p3 = scmp.lt.u32.totalorder %s730_s9, %s726_s4  ;;  %p734_p1 = scmp.lt.u32.totalorder %s726_s4, %s1032_s7 }
 0x16b   : > { %p728_p13 = pnand %p727_p10, %p955_p8 }
 0x16c   : > { %p733_p11 = por %p732_p3, %p731_p7 }
 0x16d   : > { %p729_p9 = pneg %p728_p13 }
 0x16e   : > { %p735_p4 = por %p734_p1, %p733_p11 }
 0x170   : > { %p736_p2 = pnand %p735_p4, %p729_p9 }
 0x172   : > { %739 = shalt.err (!%p736_p2)
}
 0x173   : > { %548 = dma.vmem_to_hbm [thread:$0]  (%p955_p8), %s1027_s22, 128, %s1032_s7, %s331_s8  }
 0x174 PF: > { %s357_s29 = sand.u32 1, %s778_s12   ;;  %p1099_p6 = scmp.ne.s32.totalorder %s1090_s23, 0 }
 0x175   : > { %p1100_p12 = scmp.ge.s32.totalorder %s798_s17, 2  ;;  %s358_s20 = scalar_lea.sflag [#allocation5], %s357_s29 }
 0x177   : > { %p562_p0 = pnand %p1100_p12, %p1099_p6 }
 0x179   : > { %773 = dma.done.wait (!%p562_p0), %s358_s20, 128  }
 0x17a   : > { %775 = vsyncadd (!%p562_p0), %s358_s20, 4294967168  ;;  %s20_s17 = sadd.s32 1, %s798_s17   ;;  %s1101_s12 = smov %s782_s13 }
 0x17b   : > { %p17_p5 = scmp.ge.s32.totalorder %s20_s17, 4   ;;  %s1102_s13 = smov %s786_s14 }
 0x17c   : > { %s1103_s14 = smov %s964_s30  ;;  %s1104_s15 = smov %s794_s16 }
 0x17d   : > { %s1105_s16 = smov %s1107_s11  ;;  %19 = sbr.rel (!%p17_p5) target bundleno = 7 (0x7), region = 90 }
 0x184   :  { %363 = vsyncpa [#allocation4], 1 }
 0x185   :  { %365 = vsyncpa [#allocation4 + $0x1], 1 }
 0x186   :  { %366 = vsyncpa [#allocation7], 1 }
 0x187   :  { %367 = vsyncpa [#allocation5], 1 }
 0x188   :  { %369 = vsyncpa [#allocation5 + $0x1], 1 }

</bundles_post_ra>
